<compile_context>
chip_gen: v7x
topology: tpu7x:2x2x1
jax: 0.10.0
libtpu: 0.0.40
codegen_flags: <defaults>
</compile_context>

<pallas_src>
import functools
import math

import numpy as np
import jax
import jax.numpy as jnp
from jax import lax
from jax.experimental import pallas as pl
from jax.experimental.pallas import tpu as pltpu


def _round_up(x: int, m: int) -> int:
    return ((x + m - 1) // m) * m


def _halton_sequence(n: int, d: int) -> np.ndarray:
    """Deterministic quasi-random points in [0,1)^d (Sobol stand-in)."""
    primes = [2, 3, 5, 7, 11, 13, 17, 19, 23, 29, 31, 37, 41, 43, 47, 53,
              59, 61, 67, 71, 73, 79, 83, 89, 97, 101]
    if d > len(primes):
        raise ValueError("input_dim too large for the built-in Halton bases")
    out = np.zeros((n, d), dtype=np.float64)
    for j in range(d):
        base = primes[j]
        for i in range(n):
            f, r, k = 1.0, 0.0, i + 1
            while k > 0:
                f /= base
                r += f * (k % base)
                k //= base
            out[i, j] = r
    return out


def _choose_col_tile(n_pad: int) -> int:
    """Largest multiple-of-128 divisor of n_pad, <= 2048, preferring >= 2 grid
    steps so v7x can shard the 'parallel' axis across its two TensorCores."""
    assert n_pad % 128 == 0 and n_pad > 0
    if n_pad == 128:
        return 128
    cap = max(128, min(2048, n_pad // 2))
    best = 128
    for t in range(128, cap + 1, 128):
        if n_pad % t == 0:
            best = t
    return best


# ---------------------------------------------------------------------------
# Fused per-column-tile GP posterior kernel.
# ---------------------------------------------------------------------------
def _rbf_tile(xa, z, d, inv_two_ls2, log_outputscale):
    """K(z, x_tile): (M, tn).

    Squared distances via an unrolled VPU loop over the small feature dim
    (avoids a K=d MXU pass and lane-sparse relayouts); outputscale folded into
    the exponent (one fewer VPU mul per output element)."""
    m = z.shape[0]
    tn = xa.shape[1]
    sq = jnp.zeros((m, tn), jnp.float32)
    for k in range(d):                                  # d is tiny (static unroll)
        diff = z[:, k:k + 1] - xa[k:k + 1, :]           # (M,1)-(1,tn) -> (M,tn)
        sq = sq + diff * diff
    return jnp.exp(log_outputscale - inv_two_ls2 * sq)  # (M, tn)


def _gp_fused_mean_kernel(xa_ref, z_ref, w1_ref, out_ref, *,
                          d, inv_two_ls2, log_outputscale):
    xa = xa_ref[...].astype(jnp.float32)                 # (d+1, tn): rows 0..d-1 = x^T, row d = mean_x
    z = z_ref[...].astype(jnp.float32)                   # (M, d)     resident
    kzx = _rbf_tile(xa, z, d, inv_two_ls2, log_outputscale)
    mean_x = xa[d:d + 1, :]                               # (1, tn)
    fmean = jnp.dot(w1_ref[...], kzx,
                    preferred_element_type=jnp.float32) + mean_x    # (R, tn)
    out_ref[...] = fmean.astype(out_ref.dtype)


def _gp_fused_mean_var_kernel(xa_ref, z_ref, w1_ref, b1_ref, out_ref, *,
                              d, p, inv_two_ls2, log_outputscale, outputscale):
    xa = xa_ref[...].astype(jnp.float32)                 # (d+1, tn)
    z = z_ref[...].astype(jnp.float32)                   # (M, d)
    kzx = _rbf_tile(xa, z, d, inv_two_ls2, log_outputscale)         # (M, tn)
    mean_x = xa[d:d + 1, :]                               # (1, tn)
    fmean = jnp.dot(w1_ref[...], kzx,
                    preferred_element_type=jnp.float32) + mean_x    # (R, tn)
    bk = jnp.dot(b1_ref[...], kzx,
                 preferred_element_type=jnp.float32)                # (M, tn)
    fvar = outputscale - jnp.sum(kzx * bk, axis=0, keepdims=True)   # (1, tn)
    # Pack f_var into row `p` of the (8,128)-aligned output block -> one
    # unmasked, lane-dense store stream.
    rows = lax.broadcasted_iota(jnp.int32, fmean.shape, 0)
    out_ref[...] = jnp.where(rows == p, fvar, fmean).astype(out_ref.dtype)


def gp_posterior_fused(xa, z, w1p, b1=None, *, col_tile, inv_two_ls2,
                       log_outputscale, outputscale=None, p=None):
    """Fused streamed GP posterior statistics.

    xa  : (d+1, n_pad)  rows 0..d-1 = x^T, row d = mean_x   (streamed, lane-dense)
    z   : (M, d)        inducing locations                  (resident)
    w1p : (R, M)        rows 0..P-1 = (m_u - mean_z) @ Kzz^{-1}, rest 0 (resident)
    b1  : (M, M) | None Kzz^{-1} (Kzz - S) Kzz^{-1}          (resident, var only)

    Returns (R, n_pad) f32: rows 0..P-1 = f_mean [, row P = f_var if b1 given].
    """
    dp1, n_pad = xa.shape
    d = dp1 - 1
    m, _ = z.shape
    r = w1p.shape[0]
    assert n_pad % col_tile == 0
    grid = (n_pad // col_tile,)
    col = lambda j: (0, j)
    res = lambda j: (0, 0)   # constant block index -> DMA'd once, stays resident
    cparams = pltpu.CompilerParams(dimension_semantics=("parallel",))

    if b1 is None:
        kern = functools.partial(_gp_fused_mean_kernel, d=d,
                                 inv_two_ls2=inv_two_ls2,
                                 log_outputscale=log_outputscale)
        in_specs = [pl.BlockSpec((dp1, col_tile), col),
                    pl.BlockSpec((m, d), res),
                    pl.BlockSpec((r, m), res)]
        args = (xa, z, w1p)
    else:
        kern = functools.partial(_gp_fused_mean_var_kernel, d=d, p=p,
                                 inv_two_ls2=inv_two_ls2,
                                 log_outputscale=log_outputscale,
                                 outputscale=outputscale)
        in_specs = [pl.BlockSpec((dp1, col_tile), col),
                    pl.BlockSpec((m, d), res),
                    pl.BlockSpec((r, m), res),
                    pl.BlockSpec((m, m), res)]
        args = (xa, z, w1p, b1)

    return pl.pallas_call(
        kern,
        out_shape=jax.ShapeDtypeStruct((r, n_pad), jnp.float32),
        grid_spec=pltpu.PrefetchScalarGridSpec(
            num_scalar_prefetch=0,
            grid=grid,
            in_specs=in_specs,
            out_specs=pl.BlockSpec((r, col_tile), col),
        ),
        compiler_params=cparams,
    )(*args)


# ---------------------------------------------------------------------------
# The Layer module (JAX/Pallas port, scaled-RBF GP kernel).
# ---------------------------------------------------------------------------
class Layer:
    def __init__(self, input_dim=1, output_dim=1, grid_bound=1.0, grid_num=128,
                 lengthscale=1.0, outputscale=1.0, jitter=1e-3):
        if input_dim <= 0:
            raise ValueError('Input dim must be positive, got {0}'.format(input_dim))
        if output_dim <= 0:
            raise ValueError('Output dim must be positive, got {0}'.format(output_dim))
        if grid_bound <= 0.0:
            raise ValueError('Grid bound must be positive, got {0}'.format(grid_bound))
        if grid_num <= 0:
            raise ValueError('Grid num must be positive, got {0}'.format(grid_num))
        self.input_dim = input_dim
        self.output_dim = output_dim
        self.lengthscale = float(lengthscale)
        self.outputscale = float(outputscale)
        self.jitter = float(jitter)                     # gpytorch add_jitter() default
        # TODO(synk): torch.quasirandom.SobolEngine has no JAX equivalent; a Halton
        # sequence provides the deterministic quasi-random inducing grid instead.
        locs = (2.0 * _halton_sequence(grid_num, input_dim) - 1.0) * grid_bound
        self.inducing_locs = jnp.asarray(locs, dtype=jnp.float32)      # (M, d)
        self.num_inducing = grid_num
        self.inducing_means = jnp.zeros((output_dim, grid_num), jnp.float32)
        self.inducing_scales = jnp.eye(grid_num, dtype=jnp.float32)
        self.kl_regularization = jnp.float32(0.0)
        self.training = True

    # --- small dense precompute (plain JAX, independent of n) -------------
    def _projection(self, x32):
        if self.input_dim == 1:
            return jnp.ones((1,), jnp.float32)
        # TODO(synk): torch.svd's top right-singular vector; computed via a d x d
        # eigendecomposition of X^T X (identical up to the usual sign ambiguity).
        g = x32.T @ x32
        return jnp.linalg.eigh(g)[1][:, -1]

    def _kzz_chol_inv(self):
        z = self.inducing_locs
        m = self.num_inducing
        z2 = jnp.sum(z * z, axis=1)
        sq = jnp.maximum(z2[:, None] + z2[None, :] - 2.0 * (z @ z.T), 0.0)
        kzz = (self.outputscale * jnp.exp(-0.5 * sq / self.lengthscale ** 2)
               + self.jitter * jnp.eye(m, dtype=jnp.float32))        # .add_jitter()
        # TODO(synk): Cholesky / cho_solve have no clean Pallas equivalent; tiny MxM.
        chol = jnp.linalg.cholesky(kzz)
        kzz_inv = jax.scipy.linalg.cho_solve((chol, True),
                                             jnp.eye(m, dtype=jnp.float32))
        return kzz, chol, kzz_inv

    def _streamed_input(self, x32, w):
        n = x32.shape[0]
        n_pad = _round_up(n, 128)
        col_tile = _choose_col_tile(n_pad)
        x_pad = jnp.pad(x32, ((0, n_pad - n), (0, 0)))
        mean_x = (x_pad @ w).reshape(1, n_pad)
        xa = jnp.concatenate([x_pad.T, mean_x], axis=0)               # (d+1, n_pad)
        return xa, col_tile, n_pad

    def _posterior(self, x32, with_var):
        """Returns (f_mean (P, n), f_var (1, n) or None, chol(Kzz))."""
        n = x32.shape[0]
        m = self.num_inducing
        p = self.output_dim
        z = self.inducing_locs
        inv_two_ls2 = 0.5 / self.lengthscale ** 2
        log_osc = math.log(self.outputscale)

        w = self._projection(x32)
        kzz, chol, kzz_inv = self._kzz_chol_inv()
        u = self.inducing_means - (z @ w)[None, :]                    # (P, M)
        w1 = u @ kzz_inv                                              # (P, M)
        xa, col_tile, _ = self._streamed_input(x32, w)

        if with_var:
            s_cov = self.inducing_scales @ self.inducing_scales.T     # (M, M)
            b1 = kzz_inv @ (kzz - s_cov) @ kzz_inv                    # (M, M)
            r = _round_up(p + 1, 8)
            w1p = jnp.zeros((r, m), jnp.float32).at[:p].set(w1)
            pack = gp_posterior_fused(xa, z, w1p, b1, col_tile=col_tile,
                                      inv_two_ls2=inv_two_ls2,
                                      log_outputscale=log_osc,
                                      outputscale=self.outputscale, p=p)
            return pack[:p, :n], pack[p:p + 1, :n], chol

        r = _round_up(p, 8)
        w1p = jnp.zeros((r, m), jnp.float32).at[:p].set(w1)
        pack = gp_posterior_fused(xa, z, w1p, col_tile=col_tile,
                                  inv_two_ls2=inv_two_ls2,
                                  log_outputscale=log_osc)
        return pack[:p, :n], None, chol

    def __call__(self, x, compute_kl=True, key=None):
        return self.forward(x, compute_kl=compute_kl, key=key)

    def forward(self, x, compute_kl=True, key=None):
        if x.ndim != 2 or x.shape[1] != self.input_dim:
            raise ValueError('Input must be of size (n, {0}), got {1}'.format(
                self.input_dim, tuple(x.shape)))
        n = x.shape[0]
        m = self.num_inducing
        p = self.output_dim
        x32 = x.astype(jnp.float32)

        if not self.training:
            f_mean, _, _ = self._posterior(x32, with_var=False)
            return f_mean.T                                           # (n, P)

        f_mean, f_var, chol = self._posterior(x32, with_var=True)

        if compute_kl:
            # KL( MVN(m_o, Lq Lq^T) || MVN(0, Kzz) ), summed over outputs.
            lq = self.inducing_scales
            logdet_p = 2.0 * jnp.sum(jnp.log(jnp.diagonal(chol)))
            logdet_q = 2.0 * jnp.sum(jnp.log(jnp.diagonal(lq)))
            a_tri = jax.scipy.linalg.solve_triangular(chol, lq, lower=True)
            trace_term = jnp.sum(a_tri * a_tri)
            sol = jax.scipy.linalg.cho_solve((chol, True), self.inducing_means.T)
            quad = jnp.sum(self.inducing_means.T * sol, axis=0)       # (P,)
            kl = 0.5 * (trace_term + quad - m + logdet_p - logdet_q)
            self.kl_regularization = jnp.sum(kl)

        if key is None:
            raise ValueError("training-mode forward needs a PRNG key for rsample")
        # Reparameterised sample from Normal(f_mean, sqrt(f_var)); max(.,0) guards
        # sqrt against tiny negative round-off in the variance.
        std = jnp.sqrt(jnp.maximum(f_var, 0.0))
        eps = jax.random.normal(key, (p, n), dtype=jnp.float32)
        return (f_mean + std * eps).T                                 # (n, P)


if __name__ == "__main__":
    key = jax.random.PRNGKey(0)
    k_x, k_means, k_scales, k_sample = jax.random.split(key, 4)

    input_dim, output_dim, grid_num, n = 4, 4, 128, 200
    layer = Layer(input_dim=input_dim, output_dim=output_dim,
                  grid_bound=1.0, grid_num=grid_num,
                  lengthscale=0.35, outputscale=1.0)

    # Deterministic non-trivial variational parameters (as if partially trained).
    layer.inducing_means = 0.1 * jax.random.normal(
        k_means, (output_dim, grid_num), jnp.float32)
    layer.inducing_scales = (
        jnp.eye(grid_num, dtype=jnp.float32)
        + 0.05 * jnp.tril(jax.random.normal(k_scales, (grid_num, grid_num),
                                            jnp.float32), k=-1))

    x = jax.random.normal(k_x, (n, input_dim), jnp.float32)    # n_pad=256 -> 2 tiles

    # --- eval mode: posterior mean ---------------------------------------
    layer.training = False
    f_mean_eval = layer(x)
    jax.block_until_ready(f_mean_eval)
    assert f_mean_eval.shape == (n, output_dim)
    assert bool(jnp.all(jnp.isfinite(f_mean_eval)))

    # --- train mode: reparameterised sample + KL regularization ----------
    layer.training = True
    sample = layer(x, compute_kl=True, key=k_sample)
    jax.block_until_ready(sample)
    jax.block_until_ready(layer.kl_regularization)
    assert sample.shape == (n, output_dim)
    assert bool(jnp.all(jnp.isfinite(sample)))
    assert bool(jnp.isfinite(layer.kl_regularization))

    # --- A) fused kernel vs plain-JAX on well-conditioned random operands --
    m_t, d_t, p_t, tn = 128, 4, 4, 256
    ka, kb, kc, kd_ = jax.random.split(jax.random.PRNGKey(1), 4)
    z_t = jax.random.uniform(ka, (m_t, d_t), jnp.float32, -1.0, 1.0)
    xa_t = jax.random.normal(kb, (d_t + 1, tn), jnp.float32)
    w1_t = 0.1 * jax.random.normal(kc, (8, m_t), jnp.float32)
    b1_t = 0.1 * jax.random.normal(kd_, (m_t, m_t), jnp.float32)
    ls_t, osc_t = 0.7, 1.3
    inv2 = 0.5 / ls_t ** 2
    pack_mv = gp_posterior_fused(xa_t, z_t, w1_t, b1_t, col_tile=128,
                                 inv_two_ls2=inv2,
                                 log_outputscale=math.log(osc_t),
                                 outputscale=osc_t, p=p_t)
    pack_m = gp_posterior_fused(xa_t, z_t, w1_t, col_tile=128,
                                inv_two_ls2=inv2,
                                log_outputscale=math.log(osc_t))
    sq_r = (jnp.sum(z_t * z_t, 1)[:, None]
            + jnp.sum(xa_t[:d_t].T ** 2, 1)[None, :] - 2.0 * z_t @ xa_t[:d_t])
    kzx_r = osc_t * jnp.exp(-inv2 * jnp.maximum(sq_r, 0.0))
    fm_r = w1_t @ kzx_r + xa_t[d_t:d_t + 1]
    fv_r = osc_t - jnp.sum(kzx_r * (b1_t @ kzx_r), axis=0, keepdims=True)
    assert jnp.allclose(pack_m, fm_r, rtol=1e-3, atol=1e-3)
    assert jnp.allclose(pack_mv[:p_t], fm_r[:p_t], rtol=1e-3, atol=1e-3)
    assert jnp.allclose(pack_mv[p_t:p_t + 1], fv_r, rtol=1e-3, atol=1e-3)

    # --- B) full posterior vs same-formulation plain-JAX reference --------
    def posterior_ref(layer, x):
        x32 = x.astype(jnp.float32)
        z = layer.inducing_locs
        ls, osc = layer.lengthscale, layer.outputscale
        w = layer._projection(x32)
        kzz, _, kzz_inv = layer._kzz_chol_inv()
        sq = (jnp.sum(z * z, 1)[:, None] + jnp.sum(x32 * x32, 1)[None, :]
              - 2.0 * z @ x32.T)
        kzx = osc * jnp.exp(-0.5 * jnp.maximum(sq, 0.0) / (ls * ls))
        mean_x = x32 @ w
        u = layer.inducing_means - (z @ w)[None, :]
        f_mean = mean_x[None, :] + (u @ kzz_inv) @ kzx
        s_cov = layer.inducing_scales @ layer.inducing_scales.T
        b1 = kzz_inv @ (kzz - s_cov) @ kzz_inv
        f_var = osc - jnp.sum(kzx * (b1 @ kzx), axis=0, keepdims=True)
        return f_mean, f_var

    fm_ref, fv_ref = posterior_ref(layer, x)
    fm_pal, fv_pal, _ = layer._posterior(x.astype(jnp.float32), with_var=True)
    assert jnp.allclose(fm_pal, fm_ref, rtol=2e-2, atol=2e-2)
    assert jnp.allclose(fv_pal, fv_ref, rtol=2e-2, atol=2e-2)
    assert jnp.allclose(f_mean_eval, fm_ref.T, rtol=2e-2, atol=2e-2)

    print("KERNEL_OK")
</pallas_src>

<mosaic_0001>
module attributes {stable_mosaic.version = 11 : i64} {
  func.func @_gp_fused_mean_kernel(%arg0: i32, %arg1: memref<5x128xf32, #tpu.memory_space<vmem>>, %arg2: memref<128x4xf32, #tpu.memory_space<vmem>>, %arg3: memref<8x128xf32, #tpu.memory_space<vmem>>, %arg4: memref<8x128xf32, #tpu.memory_space<vmem>>) attributes {dimension_semantics = [#tpu.dimension_semantics<parallel>], iteration_bounds = array<i64: 2>, scalar_prefetch = 0 : i64, scratch_operands = 0 : i64, tpu.core_type = #tpu.core_type<tc>, window_params = [{transform_indices = @transform_0, window_bounds = array<i64: 5, 128>}, {pipeline_mode = #tpu.pipeline_mode<synchronous>, transform_indices = @transform_1, window_bounds = array<i64: 128, 4>}, {pipeline_mode = #tpu.pipeline_mode<synchronous>, transform_indices = @transform_2, window_bounds = array<i64: 8, 128>}, {transform_indices = @transform_3, window_bounds = array<i64: 8, 128>}]} {
    %c0 = arith.constant 0 : index
    %c0_0 = arith.constant 0 : index
    %0 = vector.load %arg1[%c0, %c0_0] : memref<5x128xf32, #tpu.memory_space<vmem>>, vector<5x128xf32>
    %c0_1 = arith.constant 0 : index
    %c0_2 = arith.constant 0 : index
    %1 = vector.load %arg2[%c0_1, %c0_2] : memref<128x4xf32, #tpu.memory_space<vmem>>, vector<128x4xf32>
    %cst = arith.constant 0.000000e+00 : f32
    %2 = vector.broadcast %cst : f32 to vector<128x128xf32>
    %3 = vector.extract_strided_slice %1 {offsets = [0, 0], sizes = [128, 1], strides = [1, 1]} : vector<128x4xf32> to vector<128x1xf32>
    %4 = vector.extract_strided_slice %0 {offsets = [0, 0], sizes = [1, 128], strides = [1, 1]} : vector<5x128xf32> to vector<1x128xf32>
    %5 = vector.broadcast %3 : vector<128x1xf32> to vector<128x128xf32>
    %6 = vector.broadcast %4 : vector<1x128xf32> to vector<128x128xf32>
    %7 = arith.subf %5, %6 : vector<128x128xf32>
    %8 = arith.mulf %7, %7 : vector<128x128xf32>
    %9 = arith.addf %2, %8 : vector<128x128xf32>
    %10 = vector.extract_strided_slice %1 {offsets = [0, 1], sizes = [128, 1], strides = [1, 1]} : vector<128x4xf32> to vector<128x1xf32>
    %11 = vector.extract_strided_slice %0 {offsets = [1, 0], sizes = [1, 128], strides = [1, 1]} : vector<5x128xf32> to vector<1x128xf32>
    %12 = vector.broadcast %10 : vector<128x1xf32> to vector<128x128xf32>
    %13 = vector.broadcast %11 : vector<1x128xf32> to vector<128x128xf32>
    %14 = arith.subf %12, %13 : vector<128x128xf32>
    %15 = arith.mulf %14, %14 : vector<128x128xf32>
    %16 = arith.addf %9, %15 : vector<128x128xf32>
    %17 = vector.extract_strided_slice %1 {offsets = [0, 2], sizes = [128, 1], strides = [1, 1]} : vector<128x4xf32> to vector<128x1xf32>
    %18 = vector.extract_strided_slice %0 {offsets = [2, 0], sizes = [1, 128], strides = [1, 1]} : vector<5x128xf32> to vector<1x128xf32>
    %19 = vector.broadcast %17 : vector<128x1xf32> to vector<128x128xf32>
    %20 = vector.broadcast %18 : vector<1x128xf32> to vector<128x128xf32>
    %21 = arith.subf %19, %20 : vector<128x128xf32>
    %22 = arith.mulf %21, %21 : vector<128x128xf32>
    %23 = arith.addf %16, %22 : vector<128x128xf32>
    %24 = vector.extract_strided_slice %1 {offsets = [0, 3], sizes = [128, 1], strides = [1, 1]} : vector<128x4xf32> to vector<128x1xf32>
    %25 = vector.extract_strided_slice %0 {offsets = [3, 0], sizes = [1, 128], strides = [1, 1]} : vector<5x128xf32> to vector<1x128xf32>
    %26 = vector.broadcast %24 : vector<128x1xf32> to vector<128x128xf32>
    %27 = vector.broadcast %25 : vector<1x128xf32> to vector<128x128xf32>
    %28 = arith.subf %26, %27 : vector<128x128xf32>
    %29 = arith.mulf %28, %28 : vector<128x128xf32>
    %30 = arith.addf %23, %29 : vector<128x128xf32>
    %cst_3 = arith.constant 4.08163261 : f32
    %31 = vector.broadcast %cst_3 : f32 to vector<128x128xf32>
    %32 = arith.mulf %31, %30 : vector<128x128xf32>
    %cst_4 = arith.constant 0.000000e+00 : f32
    %33 = vector.broadcast %cst_4 : f32 to vector<128x128xf32>
    %34 = arith.subf %33, %32 : vector<128x128xf32>
    %35 = math.exp %34 : vector<128x128xf32>
    %36 = vector.extract_strided_slice %0 {offsets = [4, 0], sizes = [1, 128], strides = [1, 1]} : vector<5x128xf32> to vector<1x128xf32>
    %c0_5 = arith.constant 0 : index
    %c0_6 = arith.constant 0 : index
    %37 = vector.load %arg3[%c0_5, %c0_6] : memref<8x128xf32, #tpu.memory_space<vmem>>, vector<8x128xf32>
    %cst_7 = arith.constant dense<0.000000e+00> : vector<8x128xf32>
    %38 = tpu.matmul %37, %35, %cst_7 {dimension_numbers = #tpu.dot_dimension_numbers<[1], [0], [0], [1], [0, 0, 1, 1], [], []>} : vector<8x128xf32>, vector<128x128xf32>, vector<8x128xf32> -> vector<8x128xf32>
    %39 = vector.broadcast %36 : vector<1x128xf32> to vector<8x128xf32>
    %40 = arith.addf %38, %39 : vector<8x128xf32>
    %c0_8 = arith.constant 0 : index
    %c0_9 = arith.constant 0 : index
    %41 = vector.load %arg4[%c0_8, %c0_9] : memref<8x128xf32, #tpu.memory_space<vmem>>, vector<8x128xf32>
    tpu.vector_store %arg4[%c0_8, %c0_9], %40 {strides = array<i32>} : memref<8x128xf32, #tpu.memory_space<vmem>>, vector<8x128xf32>,
    return
  }
  func.func @transform_0(%arg0: i32) -> (i32, i32) {
    %c0_i32 = arith.constant 0 : i32
    %c0_i32_0 = arith.constant 0 : i32
    return %c0_i32, %arg0 : i32, i32
  }
  func.func @transform_1(%arg0: i32) -> (i32, i32) {
    %c0_i32 = arith.constant 0 : i32
    %c0_i32_0 = arith.constant 0 : i32
    %c0_i32_1 = arith.constant 0 : i32
    return %c0_i32, %c0_i32_0 : i32, i32
  }
  func.func @transform_2(%arg0: i32) -> (i32, i32) {
    %c0_i32 = arith.constant 0 : i32
    %c0_i32_0 = arith.constant 0 : i32
    %c0_i32_1 = arith.constant 0 : i32
    return %c0_i32, %c0_i32_0 : i32, i32
  }
  func.func @transform_3(%arg0: i32) -> (i32, i32) {
    %c0_i32 = arith.constant 0 : i32
    %c0_i32_0 = arith.constant 0 : i32
    return %c0_i32, %arg0 : i32, i32
  }
}

</mosaic_0001>

<bundles_post_ra>
// kernel: tpu_custom_call.1
= control target key start
LH: loop header
LB: loop body
LE: loop exit
PB: predicated region body
PF: predicated region fallthrough
CT: control target
= control target key end

     0   :  { %8 = vsyncpa [#allocation3], 0  ;;  %s1535_s0 = inlined_call_operand.vmem [shape: f32[5,256], index: 0, kind: input, shape index: {}]   ;;  %s1536_s1 = inlined_call_operand.vmem [shape: f32[128,4], index: 1, kind: input, shape index: {}]   ;;  %s1537_s2 = inlined_call_operand.vmem [shape: f32[8,128], index: 2, kind: input, shape index: {}]   ;;  %s1538_s3 = inlined_call_operand.hbm [shape: f32[8,256], index: 3, kind: output, shape index: {}]  }
   0x1   :  { %10 = vsyncpa [#allocation3 + $0x1], 0  ;;  %s1169_s12 = smov 0   ;;  %s1171_s13 = smov 0  }
   0x2   :  { %s1173_s14 = smov 0   ;;  %s1175_s15 = smov 0  }
   0x3 LB: > { %s1190_s16 = sadd.s32 4294967295, %s1139_s15   ;;  %s876_s17 = sadd.s32 4294967294, %s1139_s15   ;;  %s1139_s15 = sphi %s1175_s15, %s1544_s15   ;;  %s1135_s14 = sphi %s1173_s14, %s1543_s14   ;;  %s1131_s13 = sphi %s1171_s13, %s1542_s13   ;;  %s1127_s12 = sphi %s1169_s12, %s1541_s12  }
   0x4   : > { %s1194_s18 = sadd.s32 1, %s1139_s15   ;;  %s91_s19 = sadd.s32 1, %s1135_s14 }
   0x5   : > { %s88_s20 = ssub.s32 %s1139_s15, %s1194_s18  ;;  %p101_p0 = scmp.ne.s32.totalorder %s1135_s14, %s1131_s13 }
   0x6   : > { %p89_p1 = scmp.eq.s32.totalorder %s88_s20, 0  ;;  %p102_p2 = scmp.eq.s32.totalorder %s1190_s16, 1 }
   0x7   : > { %p107_p3 = scmp.ne.s32.totalorder %s1131_s13, %s1127_s12  ;;  %p108_p4 = scmp.eq.s32.totalorder %s876_s17, 1 }
   0x8   : > { %s1205_s21 = scalar_select %p89_p1, %s1135_s14, %s91_s19  }
   0x9   : > { %p1207_p5 = por %p102_p2, %p101_p0  ;;  %p1211_p6 = por %p108_p4, %p107_p3 }
   0xa   : > { %p879_p7 = scmp.ge.s32.totalorder %s1139_s15, 1  ;;  %p139_p8 = scmp.lt.s32.totalorder %s1139_s15, 3 }
   0xc   : > { %p140_p9 = pnand %p879_p7, %p139_p8 }
   0xd   : > { %v167_v0 = vld [vmem:[%s1536_s1] sm:$0xff] (!%p140_p9)  ;;  %v1141_v1 = vmov (!%p140_p9), 2   ;;  %v1142_v2 = vmov (!%p140_p9), 1   ;;  %v170_v3 = vld [vmem:[%s1536_s1 + $0x18] sm:$0xff] (!%p140_p9)  ;;  %v168_v4 = vld [vmem:[%s1536_s1 + $0x8] sm:$0xff] (!%p140_p9)  ;;  %v1143_v8 = vmov (!%p140_p9), 0   ;;  %v263_v35 = vlaneseq (!%p140_p9) }
   0xe   : > { %143 = sbr.rel (%p140_p9) target bundleno = 593 (0x251), region = 32  ;;  %1009 = vset.pattern.permute.xlu0 (!%p140_p9), %v1141_v1  ;;  %1008 = vset.pattern.permute.xlu1 (!%p140_p9), %v1142_v2  ;;  %v173_v5 = vld [vmem:[%s1536_s1 + $0x30] sm:$0xff] (!%p140_p9)  ;;  %v1235_v6 = vld [vmem:[%s1536_s1 + $0x48] sm:$0xff] (!%p140_p9)  ;;  %v171_v9 = vld [vmem:[%s1536_s1 + $0x20] sm:$0xff] (!%p140_p9)  ;;  %v1144_v13 = vmov (!%p140_p9), 3   ;;  %v1145_v18 = vmov (!%p140_p9), 0.0|0.0  }
   0xf   : > { %432 = vperm.xlu0 (!%p140_p9), %1009, %v167_v0   ;;  %316 = vperm.xlu1 (!%p140_p9), %1008, %v167_v0   ;;  %v169_v7 = vld [vmem:[%s1536_s1 + $0x10] sm:$0xff] (!%p140_p9)  ;;  %v174_v10 = vld [vmem:[%s1536_s1 + $0x38] sm:$0xff] (!%p140_p9)  ;;  %v1259_v12 = vld [vmem:[%s1536_s1 + $0x68] sm:$0xff] (!%p140_p9)  ;;  %p162_p10 = scmp.lt.s32.totalorder (!%p140_p9), %s1190_s16, 1  ;;  %v1338_v38 = vshrl.u32 (!%p140_p9), %v263_v35, 7  ;;  %vm1146_vm0 = vmmov (!%p140_p9), 0  }
  0x10   : > { %v1253_v11 = vld [vmem:[%s1536_s1 + $0x50] sm:$0xff] (!%p140_p9)  ;;  %v172_v14 = vld [vmem:[%s1536_s1 + $0x28] sm:$0xff] (!%p140_p9)  ;;  %v179_v15 = vld [vmem:[%s1536_s1 + $0x60] sm:$0xff] (!%p140_p9)  ;;  %938 = vmatprep.subr.bf16.mxu0 (!%p140_p9), %v1145_v18  ;;  %s159_s27 = sand.u32 (!%p140_p9), 1, %s1131_s13   ;;  %s883_s29 = sshll.u32 (!%p140_p9), %s1190_s16, 7 }
  0x11   : > { %v1278_v16 = vld [vmem:[%s1536_s1 + $0x78] sm:$0xff] (!%p140_p9)  ;;  %v175_v17 = vld [vmem:[%s1536_s1 + $0x40] sm:$0xff] (!%p140_p9)  ;;  %v1343_v39 = vld [vmem:[%s1536_s1 + $0x70] sm:$0xff] (!%p140_p9)  ;;  %v265_v40 = vsub.s32 (!%p140_p9), 0, %v1338_v38  ;;  %v381_v43 = vsub.s32 (!%p140_p9), 1, %v1338_v38  ;;  %v497_v45 = vsub.s32 (!%p140_p9), 2, %v1338_v38  ;;  %s1493_s7 = scalar_lea.hbm (!%p140_p9), %s1538_s3, %s883_s29 }
  0x12   : > { %v178_v19 = vld [vmem:[%s1536_s1 + $0x58] sm:$0xff] (!%p140_p9)  ;;  %v613_v53 = vsub.s32 (!%p140_p9), 3, %v1338_v38  ;;  %s880_s28 = sshll.u32 (!%p140_p9), %s159_s27, 3  ;;  %s804_s8 = scalar_lea.sflag (!%p140_p9), [#allocation3], %s159_s27 }
  0x13   : > { %444 = vperm.xlu0 (!%p140_p9), %1009, %v170_v3   ;;  %320 = vperm.xlu1 (!%p140_p9), %1008, %v168_v4   ;;  %s161_s30 = scalar_lea.vmem (!%p140_p9), [#allocation2], %s880_s28 }
  0x14   : > { %s817_s4 = sshll.u32 (!%p140_p9), %s161_s30, 4  ;;  %s1495_s4 = int_to_ptr.vmem [resolvable:$true] %s817_s4 }
  0x15   : > { %s163_s9 = scalar_select %p162_p10, %s1190_s16, 1 }
  0x16   : > { %s1148_s16 = smov [#allocation2]  }
  0x17   : > { %456 = vperm.xlu0 %1009, %v173_v5   ;;  %1010 = vset.pattern.permute.xlu1 %v1141_v1  ;;  %s881_s10 = sshll.u32 %s163_s9, 3  ;;  %s1077_s9 = scalar_lea.vmem %s1495_s4, 128 }
  0x18   : > { %436 = vperm.xlu1 %1010, %v168_v4   ;;  %s165_s24 = scalar_lea.vmem %s1535_s0, %s881_s10  ;;  %p1078_p11 = scmp.ne.s32.totalorder %s1495_s4, %s1077_s9 }
  0x19   : > { %v1354_v44 = vld [vmem:[%s165_s24] sm:$0x1f]  ;;  %s1081_s10 = sshll.u32 %s1148_s16, 4  ;;  %s1082_s10 = int_to_ptr.vmem [resolvable:$false] %s1081_s10 }
  0x1a   : > { %v1358_v46 = vrot.slane %v1354_v44, %v265_v40  ;;  %v1363_v49 = vrot.slane %v1354_v44, %v381_v43  ;;  %v1369_v51 = vrot.slane %v1354_v44, %v497_v45  ;;  %v1380_v59 = vrot.slane %v1354_v44, %v613_v53  ;;  %p1079_p12 = pnand %p1078_p11, %p1207_p5  ;;  %s1083_s11 = scalar_lea.vmem %s1082_s10, 256 }
  0x1b   : > { %468 = vperm.xlu0 %1009, %v1235_v6   ;;  %p1084_p0 = scmp.lt.s32.totalorder %s1495_s4, %s1082_s10  ;;  %p1085_p1 = scmp.lt.s32.totalorder %s1083_s11, %s1077_s9 }
  0x1c   : > { %1011 = vset.pattern.permute.xlu1 %v1143_v8  ;;  %p1080_p13 = pneg %p1079_p12 }
  0x1d   : > { %195 = vperm.xlu1 %1011, %v169_v7   ;;  %p1086_p2 = por %p1085_p1, %p1084_p0 }
  0x1f   : > { %1027 = vset.pattern.permute.xlu0 %v1142_v2  ;;  %p1087_p3 = pnand %p1086_p2, %p1080_p13 }
  0x20   : > { %332 = vperm.xlu0 %1027, %v171_v9  }
  0x21   : > { %1012 = vset.pattern.permute.xlu1 %v1142_v2 }
  0x22   : > { %324 = vperm.xlu1 %1012, %v169_v7  }
  0x24   : > { %344 = vperm.xlu0 %1027, %v174_v10  }
  0x26   : > { %328 = vperm.xlu1 %1012, %v170_v3  }
  0x28   : > { %356 = vperm.xlu0 %1027, %v1253_v11  }
  0x2a   : > { %1013 = vset.pattern.permute.xlu1 %v1144_v13 }
  0x2b   : > { %552 = vperm.xlu1 %1013, %v168_v4  }
  0x2c   : > { %368 = vperm.xlu0 %1027, %v1259_v12  }
  0x2f   : > { %1014 = vset.pattern.permute.xlu1 %v1141_v1 }
  0x30   : > { %1034 = vset.pattern.permute.xlu0 %v1143_v8  ;;  %440 = vperm.xlu1 %1014, %v169_v7  }
  0x31   : > { %185 = vperm.xlu0 %1034, %v167_v0  }
  0x34   : > { %1015 = vset.pattern.permute.xlu1 %v1143_v8 }
  0x35   : > { %190 = vperm.xlu0 %1034, %v168_v4   ;;  %205 = vperm.xlu1 %1015, %v171_v9  }
  0x39   : > { %200 = vperm.xlu0 %1034, %v170_v3   ;;  %210 = vperm.xlu1 %1015, %v172_v14  }
  0x3d   : > { %215 = vperm.xlu0 %1034, %v173_v5   ;;  %1016 = vset.pattern.permute.xlu1 %v1142_v2 }
  0x3e   : > { %336 = vperm.xlu1 %1016, %v172_v14  }
  0x41   : > { %230 = vperm.xlu0 %1034, %v1235_v6  }
  0x42   : > { %1017 = vset.pattern.permute.xlu1 %v1144_v13 }
  0x43   : > { %556 = vperm.xlu1 %1017, %v169_v7  }
  0x45   : > { %245 = vperm.xlu0 %1034, %v179_v15  }
  0x47   : > { %1018 = vset.pattern.permute.xlu1 %v1141_v1 }
  0x48   : > { %448 = vperm.xlu1 %1018, %v171_v9  }
  0x49   : > { %260 = vperm.xlu0 %1034, %v1278_v16  }
  0x4c   : > { %452 = vperm.xlu1 %1018, %v172_v14  }
  0x4d   : > { %1038 = vset.pattern.permute.xlu0 %v1144_v13 }
  0x4e   : > { %548 = vperm.xlu0 %1038, %v167_v0  }
  0x50   : > { %1019 = vset.pattern.permute.xlu1 %v1143_v8 }
  0x51   : > { %220 = vperm.xlu1 %1019, %v174_v10  }
  0x52   : > { %560 = vperm.xlu0 %1038, %v170_v3  }
  0x55   : > { %1020 = vset.pattern.permute.xlu1 %v1142_v2 }
  0x56   : > { %340 = vperm.xlu1 %1020, %v173_v5   ;;  %572 = vperm.xlu0 %1038, %v173_v5  }
  0x5a   : > { %1021 = vset.pattern.permute.xlu1 %v1144_v13  ;;  %584 = vperm.xlu0 %1038, %v1235_v6  }
  0x5b   : > { %564 = vperm.xlu1 %1021, %v171_v9  }
  0x5e   : > { %596 = vperm.xlu0 %1038, %v179_v15  }
  0x5f   : > { %568 = vperm.xlu1 %1021, %v172_v14  }
  0x62   : > { %1040 = vset.pattern.permute.xlu0 %v1141_v1 }
  0x63   : > { %1022 = vset.pattern.permute.xlu1 %v1141_v1  ;;  %480 = vperm.xlu0 %1040, %v179_v15  }
  0x64   : > { %460 = vperm.xlu1 %1022, %v174_v10  }
  0x67   : > { %492 = vperm.xlu0 %1040, %v1278_v16  }
  0x68   : > { %1023 = vset.pattern.permute.xlu1 %v1143_v8 }
  0x69   : > { %225 = vperm.xlu1 %1023, %v175_v17  }
  0x6b   : > { %1044 = vset.pattern.permute.xlu0 %v1144_v13 }
  0x6d   : > { %1024 = vset.pattern.permute.xlu1 %v1142_v2 }
  0x6e   : > { %348 = vperm.xlu1 %1024, %v175_v17  }
  0x72   : > { %352 = vperm.xlu1 %1024, %v1235_v6  }
  0x76   : > { %1025 = vset.pattern.permute.xlu1 %v1144_v13 }
  0x77   : > { %576 = vperm.xlu1 %1025, %v174_v10  }
  0x7b   : > { %1026 = vset.pattern.permute.xlu1 %v1141_v1 }
  0x7c   : > { %464 = vperm.xlu1 %1026, %v175_v17  }
  0x80   : > { %1028 = vset.pattern.permute.xlu1 %v1143_v8 }
  0x81   : > { %235 = vperm.xlu1 %1028, %v1253_v11  }
  0x85   : > { %240 = vperm.xlu1 %1028, %v178_v19  }
  0x89   : > { %1029 = vset.pattern.permute.xlu1 %v1142_v2 }
  0x8a   : > { %360 = vperm.xlu1 %1029, %v178_v19  }
  0x8e   : > { %1030 = vset.pattern.permute.xlu1 %v1144_v13  ;;  %v1307_v20 = vpop.permute.xlu1 %316  ;;  %v1309_v21 = vpop.permute.xlu0 %432 }
  0x8f   : > { %580 = vperm.xlu1 %1030, %v175_v17   ;;  %v383_v10 = vsub.f32 %v1307_v20, %v1363_v49 }
  0x91   : > { %v399_v20 = vmul.f32 %v383_v10, %v383_v10 }
  0x92   : > { %v321_v22 = vpop.permute.xlu1 %320  ;;  %v1311_v23 = vpop.permute.xlu0 %444 }
  0x93   : > { %1031 = vset.pattern.permute.xlu1 %v1141_v1  ;;  %v384_v52 = vsub.f32 %v321_v22, %v1363_v49 }
  0x94   : > { %472 = vperm.xlu1 %1031, %v1253_v11  }
  0x95   : > { %v400_v57 = vmul.f32 %v384_v52, %v384_v52 }
  0x96   : > { %v1315_v24 = vpop.permute.xlu0 %456 }
  0x97   : > { %v437_v25 = vpop.permute.xlu1 %436 }
  0x98   : > { %476 = vperm.xlu1 %1031, %v178_v19   ;;  %v500_v58 = vsub.f32 %v437_v25, %v1369_v51 }
  0x9a   : > { %v1317_v26 = vpop.permute.xlu0 %468  ;;  %v516_v0 = vmul.f32 %v500_v58, %v500_v58 }
  0x9c   : > { %1032 = vset.pattern.permute.xlu1 %v1143_v8  ;;  %v196_v27 = vpop.permute.xlu1 %195 }
  0x9d   : > { %250 = vperm.xlu1 %1032, %v1259_v12  }
  0x9f   : > { %v1321_v28 = vpop.permute.xlu0 %332 }
  0xa1   : > { %1033 = vset.pattern.permute.xlu1 %v1142_v2  ;;  %v325_v29 = vpop.permute.xlu1 %324 }
  0xa2   : > { %364 = vperm.xlu1 %1033, %v179_v15   ;;  %v385_v61 = vsub.f32 %v325_v29, %v1363_v49 }
  0xa3   : > { %v1324_v30 = vpop.permute.xlu0 %344 }
  0xa4   : > { %v401_v7 = vmul.f32 %v385_v61, %v385_v61 }
  0xa5   : > { %v1326_v31 = vpop.permute.xlu1 %328 }
  0xa6   : > { %1035 = vset.pattern.permute.xlu1 %v1144_v13  ;;  %v386_v35 = vsub.f32 %v1326_v31, %v1363_v49 }
  0xa7   : > { %588 = vperm.xlu1 %1035, %v1253_v11   ;;  %v1330_v32 = vpop.permute.xlu0 %356 }
  0xaa   : > { %v553_v33 = vpop.permute.xlu1 %552 }
  0xab   : > { %592 = vperm.xlu1 %1035, %v178_v19   ;;  %v1333_v34 = vpop.permute.xlu0 %368  ;;  %v616_v3 = vsub.f32 %v553_v33, %v1380_v59 }
  0xad   : > { %v632_v14 = vmul.f32 %v616_v3, %v616_v3 }
  0xaf   : > { %1036 = vset.pattern.permute.xlu1 %v1141_v1  ;;  %v441_v36 = vpop.permute.xlu1 %440 }
  0xb0   : > { %v186_v37 = vpop.permute.xlu0 %185  ;;  %484 = vperm.xlu1 %1036, %v1259_v12   ;;  %v501_v4 = vsub.f32 %v441_v36, %v1369_v51 }
  0xb1   : > { %v267_v5 = vsub.f32 %v186_v37, %v1358_v46 }
  0xb2   : > { %v517_v15 = vmul.f32 %v501_v4, %v501_v4 }
  0xb3   : > { %v283_v19 = vmul.f32 %v267_v5, %v267_v5 }
  0xb4   : > { %v191_v41 = vpop.permute.xlu0 %190  ;;  %1037 = vset.pattern.permute.xlu1 %v1143_v8  ;;  %v1350_v42 = vpop.permute.xlu1 %205 }
  0xb5   : > { %255 = vperm.xlu1 %1037, %v1343_v39   ;;  %v268_v50 = vsub.f32 %v191_v41, %v1358_v46  ;;  %v415_v40 = vadd.f32 %v399_v20, %v283_v19 }
  0xb7   : > { %v284_v55 = vmul.f32 %v268_v50, %v268_v50  ;;  %v402_v50 = vmul.f32 %v386_v35, %v386_v35 }
  0xb8   : > { %v201_v47 = vpop.permute.xlu0 %200  ;;  %v1360_v48 = vpop.permute.xlu1 %210 }
  0xb9   : > { %1039 = vset.pattern.permute.xlu1 %v1142_v2  ;;  %v416_v62 = vadd.f32 %v400_v57, %v284_v55  ;;  %v269_v2 = vsub.f32 %v196_v27, %v1358_v46  ;;  %v270_v22 = vsub.f32 %v201_v47, %v1358_v46 }
  0xba   : > { %372 = vperm.xlu1 %1039, %v1343_v39  }
  0xbb   : > { %v532_v8 = vadd.f32 %v516_v0, %v416_v62  ;;  %v285_v11 = vmul.f32 %v269_v2, %v269_v2  ;;  %v286_v41 = vmul.f32 %v270_v22, %v270_v22  ;;  %v271_v0 = vsub.f32 %v1350_v42, %v1358_v46 }
  0xbc   : > { %v1373_v54 = vpop.permute.xlu0 %215 }
  0xbd   : > { %v1375_v56 = vpop.permute.xlu1 %336  ;;  %v417_v27 = vadd.f32 %v401_v7, %v285_v11  ;;  %v648_v29 = vadd.f32 %v632_v14, %v532_v8  ;;  %v418_v31 = vadd.f32 %v402_v50, %v286_v41  ;;  %v287_v14 = vmul.f32 %v271_v0, %v271_v0 }
  0xbe   : > { %376 = vperm.xlu1 %1039, %v1278_v16  }
  0xbf   : > { %v533_v36 = vadd.f32 %v517_v15, %v417_v27  ;;  %v664_v43 = vmul.f32 4.0816326, %v648_v29  ;;  %v388_v15 = vsub.f32 %v1375_v56, %v1363_v49 }
  0xc0   : > { %v1382_v60 = vpop.permute.xlu0 %230 }
  0xc1   : > { %v680_v61 = vsub.f32 0.0, %v664_v43  ;;  %v404_v20 = vmul.f32 %v388_v15, %v388_v15  ;;  %v276_v15 = vsub.f32 %v1382_v60, %v1358_v46 }
  0xc2   : > { %1041 = vset.pattern.permute.xlu1 %v1144_v13  ;;  %v557_v63 = vpop.permute.xlu1 %556 }
  0xc3   : > { %600 = vperm.xlu1 %1041, %v1259_v12   ;;  %v617_v9 = vsub.f32 %v557_v63, %v1380_v59  ;;  %v499_v12 = vsub.f32 %v1309_v21, %v1369_v51  ;;  %v502_v21 = vsub.f32 %v1311_v23, %v1369_v51  ;;  %v697_v5 = vmul.f32 1.442695, %v680_v61 }
  0xc4   : > { %v1391_v6 = vpop.permute.xlu0 %245 }
  0xc5   : > { %v633_v33 = vmul.f32 %v617_v9, %v617_v9  ;;  %v515_v37 = vmul.f32 %v499_v12, %v499_v12  ;;  %v518_v53 = vmul.f32 %v502_v21, %v502_v21  ;;  %1045 = vpow2.f32 %v697_v5 }
  0xc7   : > { %1042 = vset.pattern.permute.xlu1 %v1141_v1  ;;  %v449_v17 = vpop.permute.xlu1 %448  ;;  %v649_v45 = vadd.f32 %v633_v33, %v533_v36  ;;  %v531_v55 = vadd.f32 %v515_v37, %v415_v40  ;;  %v534_v3 = vadd.f32 %v518_v53, %v418_v31 }
  0xc8   : > { %488 = vperm.xlu1 %1042, %v1343_v39   ;;  %v1401_v25 = vpop.permute.xlu0 %260  ;;  %v503_v8 = vsub.f32 %v449_v17, %v1369_v51 }
  0xc9   : > { %v665_v23 = vmul.f32 4.0816326, %v649_v45 }
  0xca   : > { %v519_v22 = vmul.f32 %v503_v8, %v503_v8 }
  0xcb   : > { %v453_v1 = vpop.permute.xlu1 %452  ;;  %v681_v7 = vsub.f32 0.0, %v665_v23 }
  0xcc   : > { %1043 = vset.pattern.permute.xlu1 %v1144_v13  ;;  %v504_v27 = vsub.f32 %v453_v1, %v1369_v51 }
  0xcd   : > { %v549_v47 = vpop.permute.xlu0 %548  ;;  %604 = vperm.xlu1 %1043, %v1343_v39   ;;  %v387_v39 = vsub.f32 %v1321_v28, %v1363_v49  ;;  %v272_v28 = vsub.f32 %v1360_v48, %v1358_v46  ;;  %v699_v19 = vmul.f32 1.442695, %v681_v7 }
  0xce   : > { %v615_v52 = vsub.f32 %v549_v47, %v1380_v59  ;;  %v520_v21 = vmul.f32 %v504_v27, %v504_v27 }
  0xcf   : > { %v288_v36 = vmul.f32 %v272_v28, %v272_v28  ;;  %v1046_v31 = vpop.eup %1045 }
  0xd0   : > { %v631_v57 = vmul.f32 %v615_v52, %v615_v52  ;;  %v1410_v58 = vpop.permute.xlu1 %220  ;;  %v273_v52 = vsub.f32 %v1373_v54, %v1358_v46 }
  0xd1   : > { %v561_v62 = vpop.permute.xlu0 %560  ;;  %608 = vperm.xlu1 %1043, %v1278_v16   ;;  %v403_v16 = vmul.f32 %v387_v39, %v387_v39  ;;  %v420_v41 = vadd.f32 %v404_v20, %v288_v36 }
  0xd2   : > { %v647_v13 = vadd.f32 %v631_v57, %v531_v55  ;;  %v618_v63 = vsub.f32 %v561_v62, %v1380_v59  ;;  %v505_v62 = vsub.f32 %v1315_v24, %v1369_v51  ;;  %v289_v39 = vmul.f32 %v273_v52, %v273_v52 }
  0xd3   : > { %v419_v33 = vadd.f32 %v403_v16, %v287_v14  ;;  %v536_v1 = vadd.f32 %v520_v21, %v420_v41  ;;  %v1147_v24 = vmov 0.0  }
  0xd4   : > { %v663_v2 = vmul.f32 4.0816326, %v647_v13  ;;  %v634_v4 = vmul.f32 %v618_v63, %v618_v63  ;;  %v521_v8 = vmul.f32 %v505_v62, %v505_v62  ;;  %935 = vmatprep.mubr.msk.f32.mxu0 %vm1146_vm0, %v1147_v24 }
  0xd5   : > { %v341_v9 = vpop.permute.xlu1 %340  ;;  %v535_v56 = vadd.f32 %v519_v22, %v419_v33  ;;  %v508_v22 = vsub.f32 %v1317_v26, %v1369_v51 }
  0xd6   : > { %v679_v10 = vsub.f32 0.0, %v663_v2  ;;  %v650_v11 = vadd.f32 %v634_v4, %v534_v3  ;;  %v389_v53 = vsub.f32 %v341_v9, %v1363_v49  ;;  %v573_v2 = vpop.permute.xlu0 %572 }
  0xd7   : > { %v621_v9 = vsub.f32 %v573_v2, %v1380_v59 }
  0xd8   : > { %v695_v12 = vmul.f32 1.442695, %v679_v10  ;;  %v666_v42 = vmul.f32 4.0816326, %v650_v11  ;;  %v405_v0 = vmul.f32 %v389_v53, %v389_v53 }
  0xda   : > { %1047 = vpow2.f32 %v695_v12  ;;  %v682_v17 = vsub.f32 0.0, %v666_v42  ;;  %v565_v29 = vpop.permute.xlu1 %564  ;;  %v421_v16 = vadd.f32 %v405_v0, %v289_v39  ;;  %v637_v12 = vmul.f32 %v621_v9, %v621_v9 }
  0xdb   : > { %v619_v35 = vsub.f32 %v565_v29, %v1380_v59  ;;  %1049 = vpow2.f32 %v699_v19  ;;  %v390_v42 = vsub.f32 %v1324_v30, %v1363_v49  ;;  %v274_v19 = vsub.f32 %v1410_v58, %v1358_v46 }
  0xdc   : > { %v701_v37 = vmul.f32 1.442695, %v682_v17  ;;  %v537_v28 = vadd.f32 %v521_v8, %v421_v16  ;;  %v292_v29 = vmul.f32 %v276_v15, %v276_v15 }
  0xdd   : > { %v635_v48 = vmul.f32 %v619_v35, %v619_v35  ;;  %v406_v35 = vmul.f32 %v390_v42, %v390_v42  ;;  %v290_v60 = vmul.f32 %v274_v19, %v274_v19 }
  0xde   : > { %1051 = vpow2.f32 %v701_v37  ;;  %v569_v40 = vpop.permute.xlu1 %568  ;;  %v653_v33 = vadd.f32 %v637_v12, %v537_v28  ;;  %v524_v37 = vmul.f32 %v508_v22, %v508_v22 }
  0xdf   : > { %v651_v43 = vadd.f32 %v635_v48, %v535_v56  ;;  %v620_v45 = vsub.f32 %v569_v40, %v1380_v59 }
  0xe0   : > { %v669_v48 = vmul.f32 4.0816326, %v653_v33 }
  0xe1   : > { %v667_v47 = vmul.f32 4.0816326, %v651_v43  ;;  %v636_v50 = vmul.f32 %v620_v45, %v620_v45  ;;  %v422_v43 = vadd.f32 %v406_v35, %v290_v60  ;;  %v393_v60 = vsub.f32 %v1330_v32, %v1363_v49 }
  0xe3   : > { %v683_v55 = vsub.f32 0.0, %v667_v47  ;;  %v652_v57 = vadd.f32 %v636_v50, %v536_v1  ;;  %v461_v61 = vpop.permute.xlu1 %460  ;;  %v685_v50 = vsub.f32 0.0, %v669_v48 }
  0xe4   : > { %v1048_v23 = vpop.eup %1047  ;;  %v506_v27 = vsub.f32 %v461_v61, %v1369_v51 }
  0xe5   : > { %v668_v13 = vmul.f32 4.0816326, %v652_v57  ;;  %v939_v63 = vpack.c.bf16 %v1046_v31, %v1048_v23  ;;  %v703_v3 = vmul.f32 1.442695, %v683_v55  ;;  %v1050_v4 = vpop.eup %1049  ;;  %v707_v55 = vmul.f32 1.442695, %v685_v50  ;;  %v585_v57 = vpop.permute.xlu0 %584 }
  0xe6   : > { %v522_v30 = vmul.f32 %v506_v27, %v506_v27 }
  0xe7   : > { %v684_v5 = vsub.f32 0.0, %v668_v13  ;;  %940 = vmatpush3.bf16.msra.mxu0 %v939_v63  ;;  %1053 = vpow2.f32 %v703_v3  ;;  %v624_v13 = vsub.f32 %v585_v57, %v1380_v59 }
  0xe8   : > { %v1052_v54 = vpop.eup %1051  ;;  %v226_v7 = vpop.permute.xlu1 %225  ;;  %941 = vmatprep.subr.bf16.mxu0 %v1145_v18  ;;  %v538_v1 = vadd.f32 %v522_v30, %v422_v43 }
  0xe9   : > { %v705_v10 = vmul.f32 1.442695, %v684_v5  ;;  %v942_v11 = vpack.c.bf16 %v1052_v54, %v1050_v4  ;;  %v640_v39 = vmul.f32 %v624_v13, %v624_v13  ;;  %v275_v2 = vsub.f32 %v226_v7, %v1358_v46 }
  0xeb   : > { %1055 = vpow2.f32 %v705_v10  ;;  %943 = vmatpush3.bf16.msra.mxu0 %v942_v11  ;;  %v291_v10 = vmul.f32 %v275_v2, %v275_v2 }
  0xec   : > { %944 = vmatprep.subr.bf16.mxu0 %v1145_v18  ;;  %1057 = vpow2.f32 %v707_v55  ;;  %v597_v55 = vpop.permute.xlu0 %596 }
  0xed   : > { %v349_v14 = vpop.permute.xlu1 %348 }
  0xee   : > { %v391_v0 = vsub.f32 %v349_v14, %v1363_v49 }
  0xf0   : > { %v407_v54 = vmul.f32 %v391_v0, %v391_v0 }
  0xf1   : > { %v353_v17 = vpop.permute.xlu1 %352  ;;  %v1054_v36 = vpop.eup %1053 }
  0xf2   : > { %v392_v20 = vsub.f32 %v353_v17, %v1363_v49  ;;  %v423_v28 = vadd.f32 %v407_v54, %v291_v10 }
  0xf4   : > { %v408_v56 = vmul.f32 %v392_v20, %v392_v20 }
  0xf5   : > { %v1056_v21 = vpop.eup %1055 }
  0xf6   : > { %v424_v40 = vadd.f32 %v408_v56, %v292_v29  ;;  %v577_v58 = vpop.permute.xlu1 %576  ;;  %v945_v41 = vpack.c.bf16 %v1056_v21, %v1054_v36  ;;  %v1058_v8 = vpop.eup %1057  ;;  %v409_v21 = vmul.f32 %v393_v60, %v393_v60 }
  0xf7   : > { %v622_v26 = vsub.f32 %v577_v58, %v1380_v59 }
  0xf8   : > { %v540_v45 = vadd.f32 %v524_v37, %v424_v40  ;;  %946 = vmatpush3.bf16.msra.mxu0 %v945_v41 }
  0xf9   : > { %v638_v47 = vmul.f32 %v622_v26, %v622_v26  ;;  %947 = vmatprep.subr.bf16.mxu0 %v1145_v18 }
  0xfa   : > { %v656_v5 = vadd.f32 %v640_v39, %v540_v45 }
  0xfb   : > { %v654_v52 = vadd.f32 %v638_v47, %v538_v1  ;;  %v465_v53 = vpop.permute.xlu1 %464 }
  0xfc   : > { %v507_v3 = vsub.f32 %v465_v53, %v1369_v51  ;;  %v672_v16 = vmul.f32 4.0816326, %v656_v5 }
  0xfd   : > { %v670_v31 = vmul.f32 4.0816326, %v654_v52 }
  0xfe   : > { %v523_v11 = vmul.f32 %v507_v3, %v507_v3  ;;  %v688_v7 = vsub.f32 0.0, %v672_v16  ;;  %v481_v3 = vpop.permute.xlu0 %480 }
  0xff   : > { %v686_v61 = vsub.f32 0.0, %v670_v31 }
 0x100   : > { %v236_v23 = vpop.permute.xlu1 %235  ;;  %v539_v42 = vadd.f32 %v523_v11, %v423_v28  ;;  %v713_v17 = vmul.f32 1.442695, %v688_v7  ;;  %v511_v11 = vsub.f32 %v481_v3, %v1369_v51 }
 0x101   : > { %v709_v62 = vmul.f32 1.442695, %v686_v61  ;;  %v277_v36 = vsub.f32 %v236_v23, %v1358_v46 }
 0x102   : > { %v527_v7 = vmul.f32 %v511_v11, %v511_v11 }
 0x103   : > { %1059 = vpow2.f32 %v709_v62  ;;  %v293_v30 = vmul.f32 %v277_v36, %v277_v36 }
 0x104   : > { %v241_v63 = vpop.permute.xlu1 %240  ;;  %1061 = vpow2.f32 %v713_v17  ;;  %v396_v17 = vsub.f32 %v1333_v34, %v1363_v49 }
 0x105   : > { %v278_v41 = vsub.f32 %v241_v63, %v1358_v46  ;;  %v425_v47 = vadd.f32 %v409_v21, %v293_v30 }
 0x107   : > { %v294_v52 = vmul.f32 %v278_v41, %v278_v41 }
 0x109   : > { %v361_v4 = vpop.permute.xlu1 %360 }
 0x10a   : > { %v394_v48 = vsub.f32 %v361_v4, %v1363_v49 }
 0x10c   : > { %v410_v32 = vmul.f32 %v394_v48, %v394_v48 }
 0x10d   : > { %v1060_v9 = vpop.eup %1059 }
 0x10e   : > { %v581_v24 = vpop.permute.xlu1 %580  ;;  %v948_v15 = vpack.c.bf16 %v1060_v9, %v1058_v8  ;;  %v1062_v40 = vpop.eup %1061  ;;  %v426_v23 = vadd.f32 %v410_v32, %v294_v52  ;;  %v279_v8 = vsub.f32 %v1391_v6, %v1358_v46 }
 0x10f   : > { %v623_v12 = vsub.f32 %v581_v24, %v1380_v59 }
 0x110   : > { %949 = vmatpush3.bf16.msra.mxu0 %v948_v15  ;;  %v295_v15 = vmul.f32 %v279_v8, %v279_v8 }
 0x111   : > { %v639_v14 = vmul.f32 %v623_v12, %v623_v12  ;;  %950 = vmatprep.subr.bf16.mxu0 %v1145_v18 }
 0x113   : > { %v655_v19 = vadd.f32 %v639_v14, %v539_v42  ;;  %v473_v22 = vpop.permute.xlu1 %472  ;;  %v627_v42 = vsub.f32 %v597_v55, %v1380_v59 }
 0x114   : > { %v509_v37 = vsub.f32 %v473_v22, %v1369_v51 }
 0x115   : > { %v671_v27 = vmul.f32 4.0816326, %v655_v19  ;;  %v643_v22 = vmul.f32 %v627_v42, %v627_v42 }
 0x116   : > { %v525_v43 = vmul.f32 %v509_v37, %v509_v37 }
 0x117   : > { %v687_v29 = vsub.f32 0.0, %v671_v27  ;;  %v477_v33 = vpop.permute.xlu1 %476 }
 0x118   : > { %v510_v26 = vsub.f32 %v477_v33, %v1369_v51  ;;  %v541_v53 = vadd.f32 %v525_v43, %v425_v47  ;;  %v493_v47 = vpop.permute.xlu0 %492 }
 0x119   : > { %v711_v20 = vmul.f32 1.442695, %v687_v29 }
 0x11a   : > { %v526_v31 = vmul.f32 %v510_v26, %v510_v26 }
 0x11b   : > { %1063 = vpow2.f32 %v711_v20 }
 0x11c   : > { %v251_v35 = vpop.permute.xlu1 %250  ;;  %v542_v63 = vadd.f32 %v526_v31, %v426_v23 }
 0x11d   : > { %v280_v6 = vsub.f32 %v251_v35, %v1358_v46 }
 0x11f   : > { %v296_v60 = vmul.f32 %v280_v6, %v280_v6  ;;  %v727_v6 = vld [vmem:[%s1537_s2] sm:$0xff] }
 0x121   : > { %v365_v56 = vpop.permute.xlu1 %364 }
 0x122   : > { %v395_v2 = vsub.f32 %v365_v56, %v1363_v49  ;;  %v412_v56 = vmul.f32 %v396_v17, %v396_v17  ;;  %v730_v17 = vsub.s32 4, %v1338_v38 }
 0x124   : > { %v411_v10 = vmul.f32 %v395_v2, %v395_v2 }
 0x125   : > { %v1064_v58 = vpop.eup %1063 }
 0x126   : > { %v589_v45 = vpop.permute.xlu1 %588  ;;  %v951_v1 = vpack.c.bf16 %v1062_v40, %v1064_v58  ;;  %v427_v14 = vadd.f32 %v411_v10, %v295_v15  ;;  %v428_v58 = vadd.f32 %v412_v56, %v296_v60 }
 0x127   : > { %v625_v50 = vsub.f32 %v589_v45, %v1380_v59 }
 0x128   : > { %952 = vmatpush3.bf16.msra.mxu0 %v951_v1  ;;  %v543_v27 = vadd.f32 %v527_v7, %v427_v14 }
 0x129   : > { %v641_v57 = vmul.f32 %v625_v50, %v625_v50  ;;  %953 = vmatprep.subr.bf16.mxu0 %v1145_v18 }
 0x12a   : > { %v593_v61 = vpop.permute.xlu1 %592  ;;  %v659_v20 = vadd.f32 %v643_v22, %v543_v27 }
 0x12b   : > { %v657_v62 = vadd.f32 %v641_v57, %v541_v53  ;;  %v626_v13 = vsub.f32 %v593_v61, %v1380_v59  ;;  %v282_v53 = vsub.f32 %v1401_v25, %v1358_v46  ;;  %v514_v61 = vsub.f32 %v493_v47, %v1369_v51 }
 0x12c   : > { %v675_v30 = vmul.f32 4.0816326, %v659_v20 }
 0x12d   : > { %v673_v39 = vmul.f32 4.0816326, %v657_v62  ;;  %v642_v0 = vmul.f32 %v626_v13, %v626_v13 }
 0x12e   : > { %v691_v26 = vsub.f32 0.0, %v675_v30 }
 0x12f   : > { %v689_v4 = vsub.f32 0.0, %v673_v39  ;;  %v658_v5 = vadd.f32 %v642_v0, %v542_v63  ;;  %v485_v54 = vpop.permute.xlu1 %484  ;;  %v298_v0 = vmul.f32 %v282_v53, %v282_v53 }
 0x130   : > { %v512_v29 = vsub.f32 %v485_v54, %v1369_v51  ;;  %v719_v57 = vmul.f32 1.442695, %v691_v26 }
 0x131   : > { %v674_v9 = vmul.f32 4.0816326, %v658_v5  ;;  %v715_v16 = vmul.f32 1.442695, %v689_v4  ;;  %v530_v4 = vmul.f32 %v514_v61, %v514_v61 }
 0x132   : > { %v528_v21 = vmul.f32 %v512_v29, %v512_v29  ;;  %v731_v29 = vrot.slane %v1354_v44, %v730_v17 }
 0x133   : > { %v690_v24 = vsub.f32 0.0, %v674_v9  ;;  %1065 = vpow2.f32 %v715_v16 }
 0x134   : > { %v256_v28 = vpop.permute.xlu1 %255  ;;  %v544_v35 = vadd.f32 %v528_v21, %v428_v58 }
 0x135   : > { %v717_v12 = vmul.f32 1.442695, %v690_v24  ;;  %v281_v45 = vsub.f32 %v256_v28, %v1358_v46 }
 0x137   : > { %1067 = vpow2.f32 %v717_v12  ;;  %v297_v23 = vmul.f32 %v281_v45, %v281_v45 }
 0x138   : > { %1069 = vpow2.f32 %v719_v57 }
 0x139   : > { %v373_v19 = vpop.permute.xlu1 %372 }
 0x13a   : > { %v397_v43 = vsub.f32 %v373_v19, %v1363_v49 }
 0x13c   : > { %v413_v31 = vmul.f32 %v397_v43, %v397_v43 }
 0x13d   : > { %v377_v33 = vpop.permute.xlu1 %376  ;;  %v1066_v36 = vpop.eup %1065 }
 0x13e   : > { %v398_v1 = vsub.f32 %v377_v33, %v1363_v49  ;;  %v429_v49 = vadd.f32 %v413_v31, %v297_v23 }
 0x140   : > { %v414_v62 = vmul.f32 %v398_v1, %v398_v1 }
 0x141   : > { %v1068_v37 = vpop.eup %1067 }
 0x142   : > { %v601_v48 = vpop.permute.xlu1 %600  ;;  %v954_v40 = vpack.c.bf16 %v1068_v37, %v1066_v36  ;;  %v430_v5 = vadd.f32 %v414_v62, %v298_v0  ;;  %v1070_v28 = vpop.eup %1069 }
 0x143   : > { %v628_v41 = vsub.f32 %v601_v48, %v1380_v59 }
 0x144   : > { %955 = vmatpush3.bf16.msra.mxu0 %v954_v40  ;;  %v546_v9 = vadd.f32 %v530_v4, %v430_v5 }
 0x145   : > { %v644_v34 = vmul.f32 %v628_v41, %v628_v41  ;;  %956 = vmatprep.subr.bf16.mxu0 %v1145_v18 }
 0x147   : > { %v660_v32 = vadd.f32 %v644_v34, %v544_v35  ;;  %v489_v50 = vpop.permute.xlu1 %488 }
 0x148   : > { %v513_v52 = vsub.f32 %v489_v50, %v1369_v51 }
 0x149   : > { %v676_v55 = vmul.f32 4.0816326, %v660_v32 }
 0x14a   : > { %v529_v63 = vmul.f32 %v513_v52, %v513_v52 }
 0x14b   : > { %v692_v13 = vsub.f32 0.0, %v676_v55 }
 0x14c   : > { %v605_v39 = vpop.permute.xlu1 %604  ;;  %v545_v46 = vadd.f32 %v529_v63, %v429_v49 }
 0x14d   : > { %v721_v2 = vmul.f32 1.442695, %v692_v13  ;;  %v629_v3 = vsub.f32 %v605_v39, %v1380_v59 }
 0x14f   : > { %1071 = vpow2.f32 %v721_v2  ;;  %v645_v25 = vmul.f32 %v629_v3, %v629_v3 }
 0x150   : > { %v609_v54 = vpop.permute.xlu1 %608 }
 0x151   : > { %v661_v8 = vadd.f32 %v645_v25, %v545_v46  ;;  %v630_v51 = vsub.f32 %v609_v54, %v1380_v59 }
 0x153   : > { %v677_v10 = vmul.f32 4.0816326, %v661_v8  ;;  %v646_v11 = vmul.f32 %v630_v51, %v630_v51 }
 0x155   : > { %v693_v16 = vsub.f32 0.0, %v677_v10  ;;  %v662_v24 = vadd.f32 %v646_v11, %v546_v9 }
 0x157   : > { %v678_v15 = vmul.f32 4.0816326, %v662_v24  ;;  %v723_v12 = vmul.f32 1.442695, %v693_v16 }
 0x159   : > { %v1072_v42 = vpop.eup %1071  ;;  %v694_v14 = vsub.f32 0.0, %v678_v15  ;;  %1073 = vpow2.f32 %v723_v12 }
 0x15a   : > { %v957_v7 = vpack.c.bf16 %v1072_v42, %v1070_v28 }
 0x15b   : > { %v725_v19 = vmul.f32 1.442695, %v694_v14 }
 0x15c   : > { %958 = vmatpush3.bf16.msra.mxu0 %v957_v7 }
 0x15d   : > { %1075 = vpow2.f32 %v725_v19  ;;  %959 = vmatprep.subr.bf16.mxu0 %v1145_v18 }
 0x163   : > { %v1074_v59 = vpop.eup %1073 }
 0x167   : > { %v1076_v22 = vpop.eup %1075 }
 0x168   : > { %v960_v27 = vpack.c.bf16 %v1076_v22, %v1074_v59 }
 0x16a   : > { %961 = vmatpush3.bf16.msra.mxu0 %v960_v27 }
 0x16d   : > { %936 = vmatmul.mubr.f32.vlgmr.msra.gmra.mrb[0].mxu0 %v727_v6 }
 0x240   : > { %v798_v18 = vpop.f32.mrb[0].mxu0 }
 0x241   : > { %v799_v33 = vadd.f32 %v798_v18, %v731_v29  ;;  %v937_v20 = vpop.f32.mrb[1].mxu0 }
 0x243   : > { %802 = vst [vmem:[%s161_s30] sm:$0xff] %v799_v33 }
 0x244   : > { %1090 = shalt.err (!%p1087_p3)
}
 0x245   : > { %s1091_s17 = scalar_lea.hbm %s1493_s7, 128  ;;  %s1095_s24 = scalar_lea.hbm %s1538_s3, 256 }
 0x246   : > { %p1092_p4 = scmp.ne.s32.totalorder %s1493_s7, %s1091_s17  ;;  %p1096_p9 = scmp.lt.u32.totalorder %s1493_s7, %s1538_s3 }
 0x247   : > { %p1097_p10 = scmp.lt.u32.totalorder %s1095_s24, %s1091_s17  ;;  %p1099_p12 = scmp.lt.u32.totalorder %s1091_s17, %s1493_s7 }
 0x248   : > { %p1093_p7 = pnand %p1092_p4, %p1207_p5 }
 0x249   : > { %p1098_p11 = por %p1097_p10, %p1096_p9 }
 0x24a   : > { %p1094_p8 = pneg %p1093_p7 }
 0x24b   : > { %p1100_p13 = por %p1099_p12, %p1098_p11 }
 0x24d   : > { %p1101_p0 = pnand %p1100_p13, %p1094_p8 }
 0x24f   : > { %1104 = shalt.err (!%p1101_p0)
}
 0x250   : > { %962 = dma.vmem_to_hbm [thread:$0]  (%p1207_p5), %s1495_s4, 128, %s1493_s7, %s804_s8  }
 0x251 PF: > { %p968_p1 = scmp.ge.s32.totalorder %s1139_s15, 2  ;;  %s829_s27 = sand.u32 1, %s1127_s12  }
 0x252   : > { %s830_s28 = scalar_lea.sflag [#allocation3], %s829_s27 }
 0x253   : > { %p965_p2 = pnand %p968_p1, %p1211_p6 }
 0x255   : > { %1122 = dma.done.wait (!%p965_p2), %s830_s28, 128  }
 0x256   : > { %1124 = vsyncadd (!%p965_p2), %s830_s28, 4294967168  ;;  %p13_p3 = scmp.ge.s32.totalorder %s1194_s18, 4   ;;  %s1541_s12 = smov %s1131_s13 }
 0x257   : > { %s1542_s13 = smov %s1135_s14  ;;  %s1543_s14 = smov %s1205_s21 }
 0x258   : > { %s1544_s15 = smov %s1194_s18  ;;  %15 = sbr.rel (!%p13_p3) target bundleno = 3 (0x3), region = 67 }
 0x25f   :  { %835 = vsyncpa [#allocation3], 1 }
 0x260   :  { %837 = vsyncpa [#allocation3 + $0x1], 1 }

</bundles_post_ra>
